<compile_context>
chip_gen: v6e
topology: v6e:2x2x1
jax: 0.10.0
libtpu: 0.0.40
codegen_flags: <defaults>
</compile_context>

<pallas_src>
import functools

import jax
import jax.numpy as jnp
from jax.experimental import pallas as pl
from jax.experimental.pallas import tpu as pltpu


_LANES = 128            # vreg lane width; last dim of the slab is lane-dense.
_DEF_MAX_TILE_ROWS = 4096   # 4096 x 128 f32 = 2 MiB/buffer; 4 buffers = 8 MiB.
_SPLIT_ROWS = 2048      # > 1 MiB -> force >= 2 grid steps (feeds both v7x TCs).


def _round_up(x, m):
    return (x + m - 1) // m * m


def _sublanes(dtype):
    """Minimum second-to-last tile dim for this dtype (8/16/32 for 4/2/1 B)."""
    return {4: 8, 2: 16, 1: 32}.get(jnp.dtype(dtype).itemsize, 8)


def _zero_act_kernel(x_ref, o_ref, *, angle_tolerance, delta):
    # Compute in f32 regardless of input dtype (bf16-safe), cast on store.
    x = x_ref[...].astype(jnp.float32)
    # sign(x) * delta as a single select; sign(0) only matters inside the
    # |x| <= tol branch, which outputs 0 anyway -> semantics preserved.
    step = jnp.where(x > 0.0, jnp.float32(delta), jnp.float32(-delta))
    out = jnp.where(jnp.abs(x) > jnp.float32(angle_tolerance),
                    x - step, jnp.float32(0.0))
    o_ref[...] = out.astype(o_ref.dtype)


def zero_act_model_ref(dof_pos, angle_tolerance=0.15, delta=0.2):
    """Pure-JAX reference matching the PyTorch module (f32 internal math)."""
    x = dof_pos.astype(jnp.float32)
    out = jnp.where(jnp.abs(x) > angle_tolerance,
                    x - delta * jnp.sign(x), 0.0)
    return out.astype(dof_pos.dtype)


def zero_act_model(dof_pos, angle_tolerance=0.15, delta=0.2,
                   min_pallas_elements=131072,
                   max_tile_rows=_DEF_MAX_TILE_ROWS):
    """Pallas equivalent of ZeroActModel.forward.

    The Pallas kernel is used when the flattened size is a multiple of 128
    (so a zero-copy lane-dense (rows, 128) view exists) and at least
    `min_pallas_elements`.  Otherwise the fused pure-JAX path is used, which
    for this elementwise op is already at the HBM roofline (1 read + 1 write)
    and avoids any pad / slice copies.
    """
    total = int(dof_pos.size)
    if (total == 0 or total < min_pallas_elements or total % _LANES != 0):
        return zero_act_model_ref(dof_pos, angle_tolerance, delta)

    itemsize = jnp.dtype(dof_pos.dtype).itemsize
    rows = total // _LANES
    sub = _sublanes(dof_pos.dtype)
    cap = max(int(max_tile_rows), sub)

    # Pick the number of grid steps, then the tile height.
    num_steps = pl.cdiv(rows, cap)
    if num_steps == 1 and rows > _SPLIT_ROWS:
        num_steps = 2                       # v7x: give both TensorCores work.
    if num_steps == 1:
        tile_rows = rows                    # single block == full array dims.
    else:
        num_steps += num_steps & 1          # even step count (v7x balance).
        tile_rows = _round_up(pl.cdiv(rows, num_steps), sub)
    grid_rows = pl.cdiv(rows, tile_rows)    # last block may be ragged.

    # Zero-copy lane-dense view (row-major reshape is a bitcast).
    slab = dof_pos.reshape(rows, _LANES)

    kernel = functools.partial(
        _zero_act_kernel,
        angle_tolerance=float(angle_tolerance),
        delta=float(delta),
    )

    out = pl.pallas_call(
        kernel,
        out_shape=jax.ShapeDtypeStruct((rows, _LANES), dof_pos.dtype),
        grid=(grid_rows,),
        in_specs=[pl.BlockSpec((tile_rows, _LANES), lambda i: (i, 0))],
        out_specs=pl.BlockSpec((tile_rows, _LANES), lambda i: (i, 0)),
        compiler_params=pltpu.CompilerParams(
            dimension_semantics=("parallel",),  # shards steps across v7x TCs.
        ),
        cost_estimate=pl.CostEstimate(
            flops=4 * total,
            transcendentals=0,
            bytes_accessed=2 * total * itemsize,  # read + write, HBM-bound.
        ),
    )(slab)

    return out.reshape(dof_pos.shape)


if __name__ == "__main__":
    key = jax.random.PRNGKey(0)
    k1, k2, k3, k4 = jax.random.split(key, 4)

    # Go2 robot deployed shape: batch=2, 12 joint positions.
    dof_small = jax.random.uniform(k1, (2, 12), jnp.float32,
                                   minval=-1.0, maxval=1.0)
    # Lane-aligned batches (batch % 32 == 0 -> total % 128 == 0), kept small.
    dof_a = jax.random.uniform(k2, (64, 12), jnp.float32,     # 768 el, 6 rows
                               minval=-1.0, maxval=1.0)
    dof_b = jax.random.uniform(k3, (320, 12), jnp.float32,    # 3840 el, 30 rows
                               minval=-1.0, maxval=1.0)
    dof_c = jax.random.uniform(k4, (2048, 12), jnp.float32,   # 24576 el, 192 rows
                               minval=-1.0, maxval=1.0)

    # 1) Default path on the deployed tiny shape -> fused pure-JAX (by design).
    out_small = jax.block_until_ready(zero_act_model(dof_small))
    ref_small = zero_act_model_ref(dof_small)
    assert out_small.shape == dof_small.shape
    assert out_small.dtype == dof_small.dtype
    assert jnp.allclose(out_small, ref_small, atol=1e-6)

    # 2) Kernel path: single full-array block (6 rows < sublane count).
    out_a = jax.block_until_ready(zero_act_model(dof_a, min_pallas_elements=0))
    assert jnp.allclose(out_a, zero_act_model_ref(dof_a), atol=1e-6)

    # 3) Kernel path: multi-step grid with a ragged last row-block
    #    (30 rows, 8-row tiles -> 4 steps, last step 6 rows).
    out_b = jax.block_until_ready(
        zero_act_model(dof_b, min_pallas_elements=0, max_tile_rows=8))
    assert jnp.allclose(out_b, zero_act_model_ref(dof_b), atol=1e-6)

    # 4) Kernel path: evenly divided grid (192 rows, 48-row tiles -> 4 steps).
    out_c = jax.block_until_ready(
        zero_act_model(dof_c, min_pallas_elements=0, max_tile_rows=64))
    assert jnp.allclose(out_c, zero_act_model_ref(dof_c), atol=1e-6)

    # 5) bf16 input exercises the dtype-aware sublane rounding (tiles of 16).
    dof_bf16 = dof_c.astype(jnp.bfloat16)
    out_bf = jax.block_until_ready(
        zero_act_model(dof_bf16, min_pallas_elements=0, max_tile_rows=48))
    ref_bf = zero_act_model_ref(dof_bf16)
    assert out_bf.dtype == jnp.bfloat16
    assert jnp.allclose(out_bf.astype(jnp.float32),
                        ref_bf.astype(jnp.float32), atol=2e-2)

    print("KERNEL_OK")
</pallas_src>

<mosaic_0001>
module attributes {stable_mosaic.version = 11 : i64} {
  func.func @_zero_act_kernel(%arg0: i32, %arg1: memref<6x128xf32, #tpu.memory_space<vmem>>, %arg2: memref<6x128xf32, #tpu.memory_space<vmem>>) attributes {dimension_semantics = [#tpu.dimension_semantics<parallel>], iteration_bounds = array<i64: 1>, scalar_prefetch = 0 : i64, scratch_operands = 0 : i64, tpu.core_type = #tpu.core_type<tc>, window_params = [{transform_indices = @transform_0, window_bounds = array<i64: 6, 128>}, {transform_indices = @transform_1, window_bounds = array<i64: 6, 128>}]} {
    %c0 = arith.constant 0 : index
    %c0_0 = arith.constant 0 : index
    %0 = vector.load %arg1[%c0, %c0_0] : memref<6x128xf32, #tpu.memory_space<vmem>>, vector<6x128xf32>
    %cst = arith.constant 0.000000e+00 : f32
    %1 = vector.broadcast %cst : f32 to vector<6x128xf32>
    %2 = arith.cmpf ogt, %0, %1 : vector<6x128xf32>
    %cst_1 = arith.constant 2.000000e-01 : f32
    %cst_2 = arith.constant -2.000000e-01 : f32
    %3 = vector.broadcast %cst_1 : f32 to vector<6x128xf32>
    %4 = vector.broadcast %cst_2 : f32 to vector<6x128xf32>
    %5 = arith.select %2, %3, %4 : vector<6x128xi1>, vector<6x128xf32>
    %6 = math.absf %0 : vector<6x128xf32>
    %cst_3 = arith.constant 1.500000e-01 : f32
    %7 = vector.broadcast %cst_3 : f32 to vector<6x128xf32>
    %8 = arith.cmpf ogt, %6, %7 : vector<6x128xf32>
    %9 = arith.subf %0, %5 : vector<6x128xf32>
    %cst_4 = arith.constant 0.000000e+00 : f32
    %10 = vector.broadcast %cst_4 : f32 to vector<6x128xf32>
    %11 = arith.select %8, %9, %10 : vector<6x128xi1>, vector<6x128xf32>
    %c0_5 = arith.constant 0 : index
    %c0_6 = arith.constant 0 : index
    %12 = vector.load %arg2[%c0_5, %c0_6] : memref<6x128xf32, #tpu.memory_space<vmem>>, vector<6x128xf32>
    tpu.vector_store %arg2[%c0_5, %c0_6], %11 {strides = array<i32>} : memref<6x128xf32, #tpu.memory_space<vmem>>, vector<6x128xf32>,
    return
  }
  func.func @transform_0(%arg0: i32) -> (i32, i32) {
    %c0_i32 = arith.constant 0 : i32
    %c0_i32_0 = arith.constant 0 : i32
    return %arg0, %c0_i32 : i32, i32
  }
  func.func @transform_1(%arg0: i32) -> (i32, i32) {
    %c0_i32 = arith.constant 0 : i32
    %c0_i32_0 = arith.constant 0 : i32
    return %arg0, %c0_i32 : i32, i32
  }
}

</mosaic_0001>

<bundles_post_ra>
// kernel: tpu_custom_call.1
= control target key start
LH: loop header
LB: loop body
LE: loop exit
PB: predicated region body
PF: predicated region fallthrough
CT: control target
= control target key end

     0   :  { %6 = vsyncpa [#allocation3], 0  ;;  %s110_s0 = inlined_call_operand.hbm [shape: f32[6,128], index: 0, kind: input, shape index: {}]   ;;  %s111_s1 = inlined_call_operand.hbm [shape: f32[6,128], index: 1, kind: output, shape index: {}]  }
   0x1   :  { %7 = vsyncpa [#allocation4], 0  ;;  %s91_s6 = smov [#allocation2]  }
   0x2   :  { %s14_s7 = sshll.u32 %s91_s6, 4  ;;  %s15_s7 = int_to_ptr.vmem [resolvable:$true] %s14_s7 }
   0x3   :  { %s55_s8 = scalar_lea.vmem %s15_s7, 128  ;;  %p60_p1 = scmp.lt.s32.totalorder %s15_s7, %s15_s7 }
   0x4   :  { %p56_p0 = scmp.ne.s32.totalorder %s15_s7, %s55_s8  ;;  %p61_p2 = scmp.lt.s32.totalorder %s55_s8, %s55_s8 }
   0x6   :  { %p62_p3 = por %p61_p2, %p60_p1 }
   0x8   :  { %p63_p4 = pnand %p62_p3, %p56_p0 }
   0xa   :  { %66 = shalt.err (!%p63_p4)
}
   0xb   :  { %17 = dma.hbm_to_vmem [thread:$0]  %s110_s0, 128, %s15_s7, [#allocation3]  }
   0xc   :  { %87 = dma.done.wait [#allocation3], 128  }
   0xd   :  { %88 = vsyncadd [#allocation3], 4294967168  ;;  %v21_v0 = vld [vmem:[#allocation2] sm:$0x3f]  ;;  %s92_s11 = smov [#allocation5]  }
   0xe   :  { %vm22_vm0 = vcmp.gt.f32.partialorder %v21_v0, 0.0  ;;  %v24_v1 = vand.u32 2147483647, %v21_v0  ;;  %s35_s12 = sshll.u32 %s92_s11, 4  ;;  %v93_v2 = vmov -0.2   ;;  %s36_s12 = int_to_ptr.vmem [resolvable:$true] %s35_s12 }
   0xf   :  { %v23_v3 = vsel %vm22_vm0, 0.2, %v93_v2  ;;  %s67_s13 = scalar_lea.vmem %s36_s12, 128  ;;  %p72_p6 = scmp.lt.s32.totalorder %s36_s12, %s36_s12 }
  0x10   :  { %vm25_vm1 = vcmp.gt.f32.partialorder %v24_v1, 0.15  ;;  %v26_v4 = vsub.f32 %v21_v0, %v23_v3  ;;  %p68_p5 = scmp.ne.s32.totalorder %s36_s12, %s67_s13  ;;  %p73_p7 = scmp.lt.s32.totalorder %s67_s13, %s67_s13 }
  0x12   :  { %v27_v5 = vsel %vm25_vm1, %v26_v4, 0.0  ;;  %p74_p8 = por %p73_p7, %p72_p6 }
  0x13   :  { %28 = vst [vmem:[#allocation5] sm:$0x3f] %v27_v5 }
  0x14   :  { %p75_p9 = pnand %p74_p8, %p68_p5 }
  0x16   :  { %78 = shalt.err (!%p75_p9)
}
  0x17   :  { %38 = dma.vmem_to_hbm [thread:$0]  %s36_s12, 128, %s111_s1, [#allocation4]  }
  0x18   :  { %89 = dma.done.wait [#allocation4], 128  }
  0x19   :  { %90 = vsyncadd [#allocation4], 4294967168 }
  0x1a   :  { %42 = vsyncpa [#allocation3], 1 }
  0x1b   :  { %43 = vsyncpa [#allocation4], 1 }

</bundles_post_ra>
